<compile_context>
chip_gen: v7x
topology: tpu7x:2x2x1
jax: 0.10.0
libtpu: 0.0.40
codegen_flags: <defaults>
</compile_context>

<pallas_src>
import jax
import jax.numpy as jnp
from jax.experimental import pallas as pl
from jax.experimental.pallas import tpu as pltpu


def _round_up(n: int, m: int) -> int:
    return ((n + m - 1) // m) * m


# Largest padded hidden size for which the fused resident-W path is used.
# 2x (double-buffer slot) * 1024^2 * 4B = 8 MiB for W, plus x/out row-block
# double buffers -- comfortably inside a 32 MiB VMEM budget on every chip gen.
_FUSED_MAX_HP = 1024
_VMEM_LIMIT = 32 * 1024 * 1024


# ---------------------------------------------------------------------------
# Kernels
# ---------------------------------------------------------------------------

def _ode_fused_kernel(x_ref, w_ref, b_ref, o_ref):
    """Fused path: o = tanh(x @ Wt + b), whole weight resident in VMEM.

    x_ref : (tm, Kp)  activation row-block (streamed over the batch grid axis)
    w_ref : (Kp, Np)  FULL transposed weight, constant index_map (DMA'd once)
    b_ref : (1,  Np)  bias, constant index_map (DMA'd once)
    o_ref : (tm, Np)  lane-dense output row-block
    No reduction grid axis, no scratch accumulator, no pl.when branches.
    """
    o_ref[...] = jnp.tanh(
        jnp.dot(x_ref[...], w_ref[...], preferred_element_type=jnp.float32)
        + b_ref[...]
    ).astype(o_ref.dtype)


def _ode_tiled_kernel(x_ref, w_ref, b_ref, o_ref):
    """Fallback for very large hidden sizes: tiled (M, N, K) matmul.

    x_ref : (tm, tk)   activations tile
    w_ref : (tk, tn)   transposed-weight tile, canonical (in, out) MXU layout
    b_ref : (1,  tn)   bias tile
    o_ref : (tm, tn)   f32 output tile, resident across K => used as the
                       accumulator directly (no VMEM scratch).
    """
    k = pl.program_id(2)

    @pl.when(k == 0)
    def _():
        o_ref[...] = jnp.zeros_like(o_ref)

    o_ref[...] += jnp.dot(
        x_ref[...], w_ref[...], preferred_element_type=jnp.float32
    )

    @pl.when(k == pl.num_programs(2) - 1)
    def _():
        o_ref[...] = jnp.tanh(o_ref[...] + b_ref[...])


# ---------------------------------------------------------------------------
# Wrappers
# ---------------------------------------------------------------------------

def prepare_ode_func_params(weight):
    """Pad + transpose the nn.Linear weight ONCE (hoist out of the solver loop).

    weight: (out_features, in_features), PyTorch layout.
    Returns the padded transposed weight of shape (Kp, Np) in canonical
    (in, out) MXU layout, with Kp/Np rounded up to multiples of 128.
    """
    out_f, in_f = weight.shape
    Kp = _round_up(in_f, 128)
    Np = _round_up(out_f, 128)
    return jnp.pad(weight, ((0, Np - out_f), (0, Kp - in_f))).T


@jax.jit
def ode_func_forward_prepared(t, x, w_t_padded, bias):
    """Pallas equivalent of ODE_Func.forward(t, x) with pre-prepared weight.

    Args:
      t:          unused scalar (API parity with the PyTorch module).
      x:          (B, in_features) float32 input.
      w_t_padded: (Kp, Np) output of prepare_ode_func_params(weight).
      bias:       (out_features,) float32 (unpadded; padding a vector is cheap).
    Returns:
      (B, out_features) float32, tanh(x @ weight.T + bias).
    """
    del t  # unused in the forward pass, matching the PyTorch module
    B, in_f = x.shape
    Kp, Np = w_t_padded.shape
    out_f = bias.shape[0]

    # ---- batch tiling (lane dim is already padded in the weight) -----------
    if B <= 512:
        Mp = _round_up(B, 8)
        tm = Mp
    else:
        Mp = _round_up(B, 256)
        tm = 256

    # Zero padding is mathematically neutral: padded x columns multiply zero
    # weight rows, padded output rows/cols are sliced away below.
    xp = jnp.pad(x, ((0, Mp - B), (0, Kp - in_f)))
    bp = jnp.pad(bias, ((0, Np - out_f),)).reshape(1, Np)

    if max(Kp, Np) <= _FUSED_MAX_HP:
        # ---- fused resident-W path (the actual ODE-RNN regime) -------------
        out_p = pl.pallas_call(
            _ode_fused_kernel,
            out_shape=jax.ShapeDtypeStruct((Mp, Np), x.dtype),
            grid=(Mp // tm,),
            in_specs=[
                pl.BlockSpec((tm, Kp), lambda i: (i, 0)),   # x row-block
                pl.BlockSpec((Kp, Np), lambda i: (0, 0)),   # W^T, resident
                pl.BlockSpec((1, Np), lambda i: (0, 0)),    # bias, resident
            ],
            out_specs=pl.BlockSpec((tm, Np), lambda i: (i, 0)),
            compiler_params=pltpu.CompilerParams(
                dimension_semantics=("parallel",),
                vmem_limit_bytes=_VMEM_LIMIT,
            ),
        )(xp, w_t_padded, bp)
        return out_p[:B, :out_f]

    # ---- tiled (M, N, K) fallback for very large hidden sizes --------------
    tn = 256 if Np % 256 == 0 else 128
    if Kp % 1024 == 0:
        tk = 1024
    elif Kp % 512 == 0:
        tk = 512
    elif Kp % 256 == 0:
        tk = 256
    else:
        tk = 128

    out_p = pl.pallas_call(
        _ode_tiled_kernel,
        out_shape=jax.ShapeDtypeStruct((Mp, Np), jnp.float32),
        grid=(Mp // tm, Np // tn, Kp // tk),
        in_specs=[
            pl.BlockSpec((tm, tk), lambda i, j, k: (i, k)),  # x tile
            pl.BlockSpec((tk, tn), lambda i, j, k: (k, j)),  # W^T tile
            pl.BlockSpec((1, tn), lambda i, j, k: (0, j)),   # bias tile
        ],
        out_specs=pl.BlockSpec((tm, tn), lambda i, j, k: (i, j)),
        compiler_params=pltpu.CompilerParams(
            dimension_semantics=("parallel", "parallel", "arbitrary"),
            vmem_limit_bytes=_VMEM_LIMIT,
        ),
    )(xp, w_t_padded, bp)
    return out_p[:B, :out_f].astype(x.dtype)


@jax.jit
def ode_func_forward(t, x, weight, bias):
    """Convenience wrapper matching the PyTorch signature (pads W per call).

    Prefer prepare_ode_func_params(...) + ode_func_forward_prepared(...) when
    calling repeatedly inside an ODE solver loop.
    """
    return ode_func_forward_prepared(t, x, prepare_ode_func_params(weight), bias)


if __name__ == "__main__":
    hidden = 32
    batch = 8

    key = jax.random.PRNGKey(0)
    k_x, k_w, k_b = jax.random.split(key, 3)

    # Deterministic params mimicking nn.Linear init: U(-1/sqrt(H), 1/sqrt(H)).
    bound = 1.0 / jnp.sqrt(jnp.float32(hidden))
    weight = jax.random.uniform(k_w, (hidden, hidden), jnp.float32, -bound, bound)
    bias = jax.random.uniform(k_b, (hidden,), jnp.float32, -bound, bound)

    x = jax.random.normal(k_x, (batch, hidden), jnp.float32)
    t = jnp.float32(0.0)  # unused, matches forward(t, x) signature

    # Hoisted-parameter usage (what an ODE solver loop should do).
    w_t = prepare_ode_func_params(weight)
    out = jax.block_until_ready(ode_func_forward_prepared(t, x, w_t, bias))
    ref = jnp.tanh(x @ weight.T + bias)
    assert out.shape == (batch, hidden)
    assert jnp.allclose(out, ref, atol=1e-5, rtol=1e-5)

    # Convenience API parity check.
    out_conv = jax.block_until_ready(ode_func_forward(t, x, weight, bias))
    assert jnp.allclose(out_conv, ref, atol=1e-5, rtol=1e-5)

    # Larger shape: multi-row-block grid with the VMEM-resident weight.
    B2, H2 = 600, 384
    x2 = jax.random.normal(jax.random.PRNGKey(1), (B2, H2), jnp.float32)
    w2 = jax.random.uniform(jax.random.PRNGKey(2), (H2, H2), jnp.float32, -0.05, 0.05)
    b2 = jax.random.uniform(jax.random.PRNGKey(3), (H2,), jnp.float32, -0.05, 0.05)
    out2 = jax.block_until_ready(ode_func_forward(t, x2, w2, b2))
    ref2 = jnp.tanh(x2 @ w2.T + b2)
    assert jnp.allclose(out2, ref2, atol=1e-4, rtol=1e-4)

    # Hidden size above the resident-W cap: exercises the tiled (M, N, K) path.
    B3, H3 = 64, 1152
    x3 = jax.random.normal(jax.random.PRNGKey(4), (B3, H3), jnp.float32)
    w3 = jax.random.uniform(jax.random.PRNGKey(5), (H3, H3), jnp.float32, -0.03, 0.03)
    b3 = jax.random.uniform(jax.random.PRNGKey(6), (H3,), jnp.float32, -0.03, 0.03)
    out3 = jax.block_until_ready(ode_func_forward(t, x3, w3, b3))
    ref3 = jnp.tanh(x3 @ w3.T + b3)
    assert jnp.allclose(out3, ref3, atol=5e-4, rtol=5e-4)

    print("KERNEL_OK")
</pallas_src>

<mosaic_0001>
module attributes {stable_mosaic.version = 11 : i64} {
  func.func @_ode_fused_kernel(%arg0: i32, %arg1: memref<8x128xf32, #tpu.memory_space<vmem>>, %arg2: memref<128x128xf32, #tpu.memory_space<vmem>>, %arg3: memref<1x128xf32, #tpu.memory_space<vmem>>, %arg4: memref<8x128xf32, #tpu.memory_space<vmem>>) attributes {dimension_semantics = [#tpu.dimension_semantics<parallel>], iteration_bounds = array<i64: 1>, scalar_prefetch = 0 : i64, scratch_operands = 0 : i64, tpu.core_type = #tpu.core_type<tc>, window_params = [{transform_indices = @transform_0, window_bounds = array<i64: 8, 128>}, {pipeline_mode = #tpu.pipeline_mode<synchronous>, transform_indices = @transform_1, window_bounds = array<i64: 128, 128>}, {pipeline_mode = #tpu.pipeline_mode<synchronous>, transform_indices = @transform_2, window_bounds = array<i64: 1, 128>}, {transform_indices = @transform_3, window_bounds = array<i64: 8, 128>}]} {
    %c0 = arith.constant 0 : index
    %c0_0 = arith.constant 0 : index
    %0 = vector.load %arg1[%c0, %c0_0] : memref<8x128xf32, #tpu.memory_space<vmem>>, vector<8x128xf32>
    %c0_1 = arith.constant 0 : index
    %c0_2 = arith.constant 0 : index
    %1 = vector.load %arg2[%c0_1, %c0_2] : memref<128x128xf32, #tpu.memory_space<vmem>>, vector<128x128xf32>
    %cst = arith.constant dense<0.000000e+00> : vector<8x128xf32>
    %2 = tpu.matmul %0, %1, %cst {dimension_numbers = #tpu.dot_dimension_numbers<[1], [0], [0], [1], [0, 0, 1, 1], [], []>} : vector<8x128xf32>, vector<128x128xf32>, vector<8x128xf32> -> vector<8x128xf32>
    %c0_3 = arith.constant 0 : index
    %c0_4 = arith.constant 0 : index
    %3 = vector.load %arg3[%c0_3, %c0_4] : memref<1x128xf32, #tpu.memory_space<vmem>>, vector<1x128xf32>
    %4 = vector.broadcast %3 : vector<1x128xf32> to vector<8x128xf32>
    %5 = arith.addf %2, %4 : vector<8x128xf32>
    %6 = math.tanh %5 : vector<8x128xf32>
    %c0_5 = arith.constant 0 : index
    %c0_6 = arith.constant 0 : index
    %7 = vector.load %arg4[%c0_5, %c0_6] : memref<8x128xf32, #tpu.memory_space<vmem>>, vector<8x128xf32>
    tpu.vector_store %arg4[%c0_5, %c0_6], %6 {strides = array<i32>} : memref<8x128xf32, #tpu.memory_space<vmem>>, vector<8x128xf32>,
    return
  }
  func.func @transform_0(%arg0: i32) -> (i32, i32) {
    %c0_i32 = arith.constant 0 : i32
    %c0_i32_0 = arith.constant 0 : i32
    return %arg0, %c0_i32 : i32, i32
  }
  func.func @transform_1(%arg0: i32) -> (i32, i32) {
    %c0_i32 = arith.constant 0 : i32
    %c0_i32_0 = arith.constant 0 : i32
    %c0_i32_1 = arith.constant 0 : i32
    return %c0_i32, %c0_i32_0 : i32, i32
  }
  func.func @transform_2(%arg0: i32) -> (i32, i32) {
    %c0_i32 = arith.constant 0 : i32
    %c0_i32_0 = arith.constant 0 : i32
    %c0_i32_1 = arith.constant 0 : i32
    return %c0_i32, %c0_i32_0 : i32, i32
  }
  func.func @transform_3(%arg0: i32) -> (i32, i32) {
    %c0_i32 = arith.constant 0 : i32
    %c0_i32_0 = arith.constant 0 : i32
    return %arg0, %c0_i32 : i32, i32
  }
}

</mosaic_0001>

<bundles_post_ra>
// kernel: ode_func_forward_prepared.1
= control target key start
LH: loop header
LB: loop body
LE: loop exit
PB: predicated region body
PF: predicated region fallthrough
CT: control target
= control target key end

     0   :  { %8 = vsyncpa [#allocation3], 0  ;;  %s331_s0 = inlined_call_operand.vmem [shape: f32[8,128], index: 0, kind: input, shape index: {}]   ;;  %s332_s1 = inlined_call_operand.hbm [shape: f32[128,128], index: 1, kind: input, shape index: {}]   ;;  %s333_s2 = inlined_call_operand.vmem [shape: f32[1,128], index: 2, kind: input, shape index: {}]   ;;  %s334_s3 = inlined_call_operand.hbm [shape: f32[8,128], index: 3, kind: output, shape index: {}]  }
   0x1   :  { %9 = vsyncpa [#allocation4], 0  ;;  %s274_s12 = smov [#allocation2]   ;;  %s226_s16 = scalar_lea.hbm %s332_s1, 2048 }
   0x2   :  { %s17_s13 = sshll.u32 %s274_s12, 4  ;;  %p227_p0 = scmp.ne.s32.totalorder %s332_s1, %s226_s16  ;;  %s18_s13 = int_to_ptr.vmem [resolvable:$true] %s17_s13 }
   0x3   :  { %p230_p1 = scmp.lt.u32.totalorder %s226_s16, %s332_s1 }
   0x5   :  { %p232_p2 = pnand %p230_p1, %p227_p0 }
   0x7   :  { %235 = shalt.err (!%p232_p2)
}
   0x8   :  { %s236_s21 = scalar_lea.vmem %s18_s13, 2048  ;;  %p241_p4 = scmp.lt.s32.totalorder %s18_s13, %s18_s13 }
   0x9   :  { %p237_p3 = scmp.ne.s32.totalorder %s18_s13, %s236_s21  ;;  %p242_p5 = scmp.lt.s32.totalorder %s236_s21, %s236_s21 }
   0xb   :  { %p243_p6 = por %p242_p5, %p241_p4 }
   0xd   :  { %p244_p7 = pnand %p243_p6, %p237_p3 }
   0xf   :  { %247 = shalt.err (!%p244_p7)
}
  0x10   :  { %s275_s22 = smov 128   ;;  %s276_s23 = smov 8  }
  0x11   :  { %23 = dma.hbm_to_vmem [thread:$0]  %s332_s1, 2048, %s18_s13, [#allocation3], %s275_s22, %s275_s22, %s276_s23  }
  0x12   :  { %270 = dma.done.wait [#allocation3], 2048  }
  0x13   :  { %271 = vsyncadd [#allocation3], 4294965248  ;;  %v277_v0 = vmov 0.0|0.0   ;;  %vm278_vm0 = vmmov 0   ;;  %v279_v1 = vmov 0.0   ;;  %v30_v2 = vld [vmem:[#allocation2] sm:$0xff] }
  0x14   :  { %193 = vmatprep.subr.bf16.mxu0 %v277_v0  ;;  %190 = vmatprep.mubr.msk.f32.mxu0 %vm278_vm0, %v279_v1  ;;  %v31_v3 = vld [vmem:[#allocation2 + $0x8] sm:$0xff]  ;;  %v32_v4 = vld [vmem:[#allocation2 + $0x10] sm:$0xff]  ;;  %v33_v6 = vld [vmem:[#allocation2 + $0x18] sm:$0xff]  ;;  %s280_s29 = smov [#allocation5]  }
  0x15   :  { %v194_v5 = vpack.c.bf16 %v31_v3, %v30_v2  ;;  %v197_v7 = vpack.c.bf16 %v33_v6, %v32_v4  ;;  %v34_v8 = vld [vmem:[#allocation2 + $0x20] sm:$0xff]  ;;  %v35_v9 = vld [vmem:[#allocation2 + $0x28] sm:$0xff]  ;;  %v36_v11 = vld [vmem:[#allocation2 + $0x30] sm:$0xff]  ;;  %s131_s30 = sshll.u32 %s280_s29, 4  ;;  %s132_s30 = int_to_ptr.vmem [resolvable:$true] %s131_s30 }
  0x16   :  { %v200_v10 = vpack.c.bf16 %v35_v9, %v34_v8  ;;  %v37_v12 = vld [vmem:[#allocation2 + $0x38] sm:$0xff]  ;;  %v38_v14 = vld [vmem:[#allocation2 + $0x40] sm:$0xff]  ;;  %v39_v15 = vld [vmem:[#allocation2 + $0x48] sm:$0xff]  ;;  %s248_s4 = scalar_lea.vmem %s132_s30, 128  ;;  %p253_p9 = scmp.lt.s32.totalorder %s132_s30, %s132_s30 }
  0x17   :  { %195 = vmatpush3.bf16.msra.mxu0 %v194_v5  ;;  %v203_v13 = vpack.c.bf16 %v37_v12, %v36_v11  ;;  %v206_v16 = vpack.c.bf16 %v39_v15, %v38_v14  ;;  %v40_v17 = vld [vmem:[#allocation2 + $0x50] sm:$0xff]  ;;  %v41_v18 = vld [vmem:[#allocation2 + $0x58] sm:$0xff]  ;;  %v42_v20 = vld [vmem:[#allocation2 + $0x60] sm:$0xff]  ;;  %p249_p8 = scmp.ne.s32.totalorder %s132_s30, %s248_s4  ;;  %p254_p10 = scmp.lt.s32.totalorder %s248_s4, %s248_s4 }
  0x18   :  { %196 = vmatprep.subr.bf16.mxu0 %v277_v0  ;;  %v209_v19 = vpack.c.bf16 %v41_v18, %v40_v17  ;;  %v43_v21 = vld [vmem:[#allocation2 + $0x68] sm:$0xff]  ;;  %v44_v23 = vld [vmem:[#allocation2 + $0x70] sm:$0xff]  ;;  %v45_v24 = vld [vmem:[#allocation2 + $0x78] sm:$0xff] }
  0x19   :  { %v212_v22 = vpack.c.bf16 %v43_v21, %v42_v20  ;;  %v215_v25 = vpack.c.bf16 %v45_v24, %v44_v23  ;;  %v29_v26 = vld [vmem:[%s331_s0] sm:$0xff]  ;;  %p255_p11 = por %p254_p10, %p253_p9 }
  0x1a   :  { %v140_v27 = vld [vmem:[%s333_s2] ss:$0 sm:$0xff] }
  0x1b   :  { %198 = vmatpush3.bf16.msra.mxu0 %v197_v7  ;;  %p256_p12 = pnand %p255_p11, %p249_p8 }
  0x1c   :  { %199 = vmatprep.subr.bf16.mxu0 %v277_v0 }
  0x1f   :  { %201 = vmatpush3.bf16.msra.mxu0 %v200_v10 }
  0x20   :  { %202 = vmatprep.subr.bf16.mxu0 %v277_v0 }
  0x23   :  { %204 = vmatpush3.bf16.msra.mxu0 %v203_v13 }
  0x24   :  { %205 = vmatprep.subr.bf16.mxu0 %v277_v0 }
  0x27   :  { %207 = vmatpush3.bf16.msra.mxu0 %v206_v16 }
  0x28   :  { %208 = vmatprep.subr.bf16.mxu0 %v277_v0 }
  0x2b   :  { %210 = vmatpush3.bf16.msra.mxu0 %v209_v19 }
  0x2c   :  { %211 = vmatprep.subr.bf16.mxu0 %v277_v0 }
  0x2f   :  { %213 = vmatpush3.bf16.msra.mxu0 %v212_v22 }
  0x30   :  { %214 = vmatprep.subr.bf16.mxu0 %v277_v0 }
  0x33   :  { %216 = vmatpush3.bf16.msra.mxu0 %v215_v25 }
  0x36   :  { %191 = vmatmul.mubr.f32.vlgmr.msra.gmra.mrb[0].mxu0 %v29_v26 }
 0x109   :  { %v119_v28 = vpop.f32.mrb[0].mxu0 }
 0x10a   :  { %v120_v29 = vadd.f32 %v140_v27, %v119_v28  ;;  %v192_v30 = vpop.f32.mrb[1].mxu0 }
 0x10c   :  { %224 = vtanh.f32 %v120_v29 }
 0x116   :  { %v225_v31 = vpop.eup %224 }
 0x117   :  { %124 = vst [vmem:[#allocation5] sm:$0xff] %v225_v31 }
 0x118   :  { %259 = shalt.err (!%p256_p12)
}
 0x119   :  { %s260_s2 = scalar_lea.hbm %s334_s3, 128 }
 0x11a   :  { %p261_p13 = scmp.ne.s32.totalorder %s334_s3, %s260_s2  ;;  %p264_p0 = scmp.lt.u32.totalorder %s260_s2, %s334_s3 }
 0x11c   :  { %p266_p1 = pnand %p264_p0, %p261_p13 }
 0x11e   :  { %269 = shalt.err (!%p266_p1)
}
 0x11f   :  { %134 = dma.vmem_to_hbm [thread:$0]  %s132_s30, 128, %s334_s3, [#allocation4]  }
 0x120   :  { %272 = dma.done.wait [#allocation4], 128  }
 0x121   :  { %273 = vsyncadd [#allocation4], 4294967168 }
 0x122   :  { %138 = vsyncpa [#allocation3], 1 }
 0x123   :  { %139 = vsyncpa [#allocation4], 1 }

</bundles_post_ra>
